<compile_context>
chip_gen: v7x
topology: tpu7x:2x2x1
jax: 0.10.0
libtpu: 0.0.40
codegen_flags: <defaults>
</compile_context>

<pallas_src>
import functools
import math

import jax
import jax.numpy as jnp
from jax.experimental import pallas as pl
from jax.experimental.pallas import tpu as pltpu


_VPU_SMALL_K = 8   # first-layer fan_in below this  -> VPU broadcast MACs, no MXU
_VPU_SMALL_M = 8   # last-layer  fan_out below this -> VPU mul + XLU reduce, no MXU
_MAX_TILE_B = 1024


def _round_up(n, m):
    return ((n + m - 1) // m) * m


# ----------------------------------------------------------------------------- #
# Chip introspection (host-side, best-effort; safe fallbacks everywhere).
# ----------------------------------------------------------------------------- #
def _device_kind():
    try:
        return str(getattr(jax.devices()[0], "device_kind", "")).lower()
    except Exception:
        return ""


def _tensorcores_per_chip():
    """Best-effort TensorCore-per-chip count (v5e/v6e: 1, v7x: 2, v4 megacore: 2)."""
    try:
        info = pltpu.get_tpu_info()
        for attr in ("num_cores", "core_count", "num_tensorcores", "tensorcore_count"):
            v = getattr(info, attr, None)
            if isinstance(v, int) and 1 <= v <= 8:
                return v
    except Exception:
        pass
    try:
        dev = jax.devices()[0]
        for attr in ("num_cores", "core_count"):
            v = getattr(dev, attr, None)
            if isinstance(v, int) and 1 <= v <= 8:
                return v
    except Exception:
        pass
    kind = _device_kind()
    if "v7" in kind or "7x" in kind or "v4" in kind:
        return 2
    return 1


def _default_bf16():
    """bf16 MXU inputs are the native fast path on v6e/v7x; keep f32 on v5e/unknown."""
    kind = _device_kind()
    return ("v6" in kind) or ("v7" in kind) or ("7x" in kind)


def _pick_tile_b(B, tile_b, num_cores):
    """Lane-dense batch tile, capped at 1024.

    1-TC chips (v5e/v6e): a single grid step for B <= 1024 (per-step overhead is
    the dominant cost of this tiny kernel).  2-TC chips (v7x): keep >= 2 steps and
    prefer an even step count so the "parallel" axis shards evenly across cores.
    """
    if tile_b is not None:
        return tile_b
    cands = (_MAX_TILE_B, 512, 256, 128)
    if num_cores <= 1:
        if B <= _MAX_TILE_B:
            return B
        for c in cands:
            if B % c == 0:
                return c
        return B
    # multi-TensorCore: balanced even split first, then any >=2-step split.
    for c in cands:
        if B % c == 0 and B // c >= 2 and (B // c) % 2 == 0:
            return c
    for c in cands:
        if B % c == 0 and B // c >= 2:
            return c
    return B


# ----------------------------------------------------------------------------- #
# Parameter slab packing: one (rows, >=128) f32 array, 8-row-aligned blocks.
# ----------------------------------------------------------------------------- #
def _pack_params(params, vpu_last):
    """Pack [W1, b1, W2, b2, ...] into a single padded f32 slab.

    Returns (slab, offsets) where offsets[i] = (w_row_off, b_row_off) for layer i.
    The last layer's weight is stored transposed (fan_in, fan_out) when it will be
    evaluated on the VPU/XLU path, so the kernel can slice a ready-made column.
    """
    n = len(params)
    max_fan_in = max(W.shape[1] for W, _ in params)
    C = max(128, _round_up(max_fan_in, 128))

    blocks = []
    offsets = []
    row = 0
    for i, (W, b) in enumerate(params):
        fan_out, fan_in = W.shape
        Wm = jnp.asarray(W, jnp.float32)
        if vpu_last and i == n - 1:
            Wm = Wm.T                          # (fan_in, fan_out)
        wr, wc = Wm.shape
        wr_pad = _round_up(wr, 8)
        wblk = jnp.zeros((wr_pad, C), jnp.float32).at[:wr, :wc].set(Wm)

        br_pad = _round_up(fan_out, 8)
        bblk = jnp.zeros((br_pad, C), jnp.float32).at[:fan_out, 0].set(
            jnp.asarray(b, jnp.float32).reshape(-1))

        offsets.append((row, row + wr_pad))
        blocks += [wblk, bblk]
        row += wr_pad + br_pad

    slab = jnp.concatenate(blocks, axis=0)     # (rows, C) f32
    return slab, tuple(offsets)


# ----------------------------------------------------------------------------- #
# Fused MLP kernel (feature-major: batch on lanes everywhere).
# ----------------------------------------------------------------------------- #
def _make_mlp_kernel(layer_dims, offsets, vpu_first, vpu_last, use_bf16_matmul):
    num_layers = len(layer_dims)

    def kernel(x_ref, p_ref, o_ref):
        # x_ref: (d_in, tile_b), p_ref: param slab (rows, C), o_ref: (d_out, tile_b)
        h = x_ref[...].astype(jnp.float32)
        for i, (fan_out, fan_in) in enumerate(layer_dims):
            w_off, b_off = offsets[i]
            b = p_ref[b_off:b_off + fan_out, 0:1]              # (fan_out, 1) f32
            is_last = i == num_layers - 1

            if i == 0 and vpu_first:
                # Tiny contraction (K = fan_in): broadcast MACs on the VPU.
                w = p_ref[w_off:w_off + fan_out, 0:fan_in]     # (fan_out, fan_in)
                acc = w[:, 0:1] * h[0:1, :]
                for k in range(1, fan_in):
                    acc = acc + w[:, k:k + 1] * h[k:k + 1, :]
                h = acc + b
            elif is_last and vpu_last:
                # M = fan_out tiny: elementwise mul (VPU) + sublane reduce (XLU).
                wt = p_ref[w_off:w_off + fan_in, 0:fan_out]    # (fan_in, fan_out)
                parts = [jnp.sum(h * wt[:, r:r + 1], axis=0, keepdims=True)
                         for r in range(fan_out)]
                z = parts[0] if fan_out == 1 else jnp.concatenate(parts, axis=0)
                h = z + b
            else:
                w = p_ref[w_off:w_off + fan_out, 0:fan_in]     # (fan_out, fan_in)
                if use_bf16_matmul:
                    lhs = w.astype(jnp.bfloat16)
                    rhs = h.astype(jnp.bfloat16)
                else:
                    lhs, rhs = w, h
                h = jnp.dot(lhs, rhs, preferred_element_type=jnp.float32) + b

            if not is_last:                                    # hidden layers: tanh (f32, EUP)
                h = jnp.tanh(h)

        o_ref[...] = h.astype(o_ref.dtype)                     # lane-dense store

    return kernel


# ----------------------------------------------------------------------------- #
# Public wrapper.
# ----------------------------------------------------------------------------- #
def neural_net_forward(x, params, *, tile_b=None, use_bf16_matmul=None,
                       x_feature_major=False, feature_major_output=False):
    """Forward pass of NeuralNet.

    x:      (B, layers[0]) batch-major (PyTorch-style), or (layers[0], B) if
            x_feature_major=True (recommended for large collocation batches —
            avoids a host-side transpose that can exceed the kernel runtime).
    params: list of (W, b) in PyTorch layout: W is (out, in), b is (out,).
    Returns (B, layers[-1]) float32 (or (layers[-1], B) if feature_major_output).
    """
    layer_dims = tuple((W.shape[0], W.shape[1]) for W, _ in params)
    d_in = layer_dims[0][1]
    d_out = layer_dims[-1][0]

    if x_feature_major:
        assert x.shape[0] == d_in
        x_t = x
    else:
        assert x.shape[1] == d_in
        # (B,1) -> (1,B) is layout-free; otherwise a small (B,d_in) transpose.
        x_t = x.reshape(1, -1) if d_in == 1 else x.T
    B = x_t.shape[1]

    if use_bf16_matmul is None:
        use_bf16_matmul = _default_bf16()

    num_cores = _tensorcores_per_chip()
    tb = _pick_tile_b(B, tile_b, num_cores)
    assert B % tb == 0, "batch must be a multiple of tile_b"

    vpu_first = d_in <= _VPU_SMALL_K
    vpu_last = len(layer_dims) > 1 and d_out <= _VPU_SMALL_M
    slab, offsets = _pack_params(params, vpu_last)

    kernel = _make_mlp_kernel(layer_dims, offsets, vpu_first, vpu_last,
                              use_bf16_matmul)

    y_t = pl.pallas_call(
        kernel,
        out_shape=jax.ShapeDtypeStruct((d_out, B), jnp.float32),
        grid=(B // tb,),
        in_specs=[
            pl.BlockSpec((d_in, tb), lambda i: (0, i)),
            # Constant block index -> Pallas pipelining DMAs the slab only once
            # (copy is skipped when the block index is unchanged across steps).
            pl.BlockSpec(slab.shape, lambda i: (0, 0)),
        ],
        out_specs=pl.BlockSpec((d_out, tb), lambda i: (0, i)),
        compiler_params=pltpu.CompilerParams(
            dimension_semantics=("parallel",),
        ),
    )(x_t.astype(jnp.float32), slab)

    if feature_major_output:
        return y_t
    # (1,B) -> (B,1) is a reshape, not a transpose.
    return y_t.reshape(B, 1) if d_out == 1 else y_t.T


# ----------------------------------------------------------------------------- #
# Init + pure-JAX reference (PyTorch semantics).
# ----------------------------------------------------------------------------- #
def init_params(layers, key):
    """nn.Linear-style init (uniform +-1/sqrt(fan_in)); PyTorch (out, in) layout."""
    params = []
    for i in range(len(layers) - 1):
        fan_in, fan_out = layers[i], layers[i + 1]
        key, kw, kb = jax.random.split(key, 3)
        bound = 1.0 / math.sqrt(fan_in)
        W = jax.random.uniform(kw, (fan_out, fan_in), jnp.float32, -bound, bound)
        b = jax.random.uniform(kb, (fan_out,), jnp.float32, -bound, bound)
        params.append((W, b))
    return params


def neural_net_reference(x, params):
    h = x
    for W, b in params[:-1]:
        h = jnp.tanh(h @ W.T + b)
    W, b = params[-1]
    return h @ W.T + b


if __name__ == "__main__":
    # PINN layers: 2 input coords -> 32 -> 32 -> 1 scalar output.
    layers = [2, 32, 32, 1]
    batch = 256  # collocation points

    key = jax.random.PRNGKey(0)
    key, kx = jax.random.split(key)
    x = jax.random.normal(kx, (batch, layers[0]), jnp.float32)
    params = init_params(layers, key)

    y_ref = neural_net_reference(x, params)

    # f32 MXU path — tight check against the reference.
    fwd_f32 = jax.jit(functools.partial(neural_net_forward, use_bf16_matmul=False))
    y = fwd_f32(x, params)
    jax.block_until_ready(y)
    assert y.shape == (batch, layers[-1])
    assert jnp.allclose(y, y_ref, atol=1e-5, rtol=1e-5), "f32 mismatch vs reference"

    # Feature-major fast path (no host-side x.T) — identical numerics.
    fwd_fm = jax.jit(functools.partial(neural_net_forward, use_bf16_matmul=False,
                                       x_feature_major=True))
    y_fm = fwd_fm(x.T, params)
    jax.block_until_ready(y_fm)
    assert jnp.allclose(y_fm, y_ref, atol=1e-5, rtol=1e-5), "feature-major mismatch"

    # bf16 MXU-input path (default on v6e/v7x; f32 accumulate + f32 tanh) — loose check.
    fwd_bf16 = jax.jit(functools.partial(neural_net_forward, use_bf16_matmul=True))
    y_b = fwd_bf16(x, params)
    jax.block_until_ready(y_b)
    assert jnp.allclose(y_b, y_ref, atol=2e-2, rtol=2e-2), "bf16 mismatch vs reference"

    print("KERNEL_OK")
</pallas_src>

<mosaic_0001>
module attributes {stable_mosaic.version = 11 : i64} {
  func.func @kernel(%arg0: i32, %arg1: memref<2x256xf32, #tpu.memory_space<vmem>>, %arg2: memref<168x128xf32, #tpu.memory_space<vmem>>, %arg3: memref<1x256xf32, #tpu.memory_space<vmem>>) attributes {dimension_semantics = [#tpu.dimension_semantics<parallel>], iteration_bounds = array<i64: 1>, scalar_prefetch = 0 : i64, scratch_operands = 0 : i64, tpu.core_type = #tpu.core_type<tc>, window_params = [{transform_indices = @transform_0, window_bounds = array<i64: 2, 256>}, {pipeline_mode = #tpu.pipeline_mode<synchronous>, transform_indices = @transform_1, window_bounds = array<i64: 168, 128>}, {transform_indices = @transform_2, window_bounds = array<i64: 1, 256>}]} {
    %c0 = arith.constant 0 : index
    %c0_0 = arith.constant 0 : index
    %0 = vector.load %arg1[%c0, %c0_0] : memref<2x256xf32, #tpu.memory_space<vmem>>, vector<2x256xf32>
    %c32 = arith.constant 32 : index
    %c0_1 = arith.constant 0 : index
    %1 = vector.load %arg2[%c32, %c0_1] : memref<168x128xf32, #tpu.memory_space<vmem>>, vector<32x1xf32>
    %c0_2 = arith.constant 0 : index
    %c0_3 = arith.constant 0 : index
    %2 = vector.load %arg2[%c0_2, %c0_3] : memref<168x128xf32, #tpu.memory_space<vmem>>, vector<32x2xf32>
    %3 = vector.extract_strided_slice %2 {offsets = [0, 0], sizes = [32, 1], strides = [1, 1]} : vector<32x2xf32> to vector<32x1xf32>
    %4 = vector.extract_strided_slice %0 {offsets = [0, 0], sizes = [1, 256], strides = [1, 1]} : vector<2x256xf32> to vector<1x256xf32>
    %5 = vector.broadcast %3 : vector<32x1xf32> to vector<32x256xf32>
    %6 = vector.broadcast %4 : vector<1x256xf32> to vector<32x256xf32>
    %7 = arith.mulf %5, %6 : vector<32x256xf32>
    %8 = vector.extract_strided_slice %2 {offsets = [0, 1], sizes = [32, 1], strides = [1, 1]} : vector<32x2xf32> to vector<32x1xf32>
    %9 = vector.extract_strided_slice %0 {offsets = [1, 0], sizes = [1, 256], strides = [1, 1]} : vector<2x256xf32> to vector<1x256xf32>
    %10 = vector.broadcast %8 : vector<32x1xf32> to vector<32x256xf32>
    %11 = vector.broadcast %9 : vector<1x256xf32> to vector<32x256xf32>
    %12 = arith.mulf %10, %11 : vector<32x256xf32>
    %13 = arith.addf %7, %12 : vector<32x256xf32>
    %14 = vector.broadcast %1 : vector<32x1xf32> to vector<32x256xf32>
    %15 = arith.addf %13, %14 : vector<32x256xf32>
    %16 = math.tanh %15 : vector<32x256xf32>
    %c96 = arith.constant 96 : index
    %c0_4 = arith.constant 0 : index
    %17 = vector.load %arg2[%c96, %c0_4] : memref<168x128xf32, #tpu.memory_space<vmem>>, vector<32x1xf32>
    %c64 = arith.constant 64 : index
    %c0_5 = arith.constant 0 : index
    %18 = vector.load %arg2[%c64, %c0_5] : memref<168x128xf32, #tpu.memory_space<vmem>>, vector<32x32xf32>
    %cst = arith.constant dense<0.000000e+00> : vector<32x256xf32>
    %19 = tpu.matmul %18, %16, %cst {dimension_numbers = #tpu.dot_dimension_numbers<[1], [0], [0], [1], [0, 0, 1, 1], [], []>} : vector<32x32xf32>, vector<32x256xf32>, vector<32x256xf32> -> vector<32x256xf32>
    %20 = vector.broadcast %17 : vector<32x1xf32> to vector<32x256xf32>
    %21 = arith.addf %19, %20 : vector<32x256xf32>
    %22 = math.tanh %21 : vector<32x256xf32>
    %c160 = arith.constant 160 : index
    %c0_6 = arith.constant 0 : index
    %23 = vector.load %arg2[%c160, %c0_6] : memref<168x128xf32, #tpu.memory_space<vmem>>, vector<1x1xf32>
    %c128 = arith.constant 128 : index
    %c0_7 = arith.constant 0 : index
    %24 = vector.load %arg2[%c128, %c0_7] : memref<168x128xf32, #tpu.memory_space<vmem>>, vector<32x1xf32>
    %25 = vector.broadcast %24 : vector<32x1xf32> to vector<32x256xf32>
    %26 = arith.mulf %22, %25 : vector<32x256xf32>
    %cst_8 = arith.constant dense<0.000000e+00> : vector<256xf32>
    %27 = vector.multi_reduction <add>, %26, %cst_8 [0] : vector<32x256xf32> to vector<256xf32>
    %28 = vector.shape_cast %27 : vector<256xf32> to vector<1x256xf32>
    %29 = vector.broadcast %23 : vector<1x1xf32> to vector<1x256xf32>
    %30 = arith.addf %28, %29 : vector<1x256xf32>
    %c0_9 = arith.constant 0 : index
    %c0_10 = arith.constant 0 : index
    %31 = vector.load %arg3[%c0_9, %c0_10] : memref<1x256xf32, #tpu.memory_space<vmem>>, vector<1x256xf32>
    tpu.vector_store %arg3[%c0_9, %c0_10], %30 {strides = array<i32>} : memref<1x256xf32, #tpu.memory_space<vmem>>, vector<1x256xf32>,
    return
  }
  func.func @transform_0(%arg0: i32) -> (i32, i32) {
    %c0_i32 = arith.constant 0 : i32
    %c0_i32_0 = arith.constant 0 : i32
    return %c0_i32, %arg0 : i32, i32
  }
  func.func @transform_1(%arg0: i32) -> (i32, i32) {
    %c0_i32 = arith.constant 0 : i32
    %c0_i32_0 = arith.constant 0 : i32
    %c0_i32_1 = arith.constant 0 : i32
    return %c0_i32, %c0_i32_0 : i32, i32
  }
  func.func @transform_2(%arg0: i32) -> (i32, i32) {
    %c0_i32 = arith.constant 0 : i32
    %c0_i32_0 = arith.constant 0 : i32
    return %c0_i32, %arg0 : i32, i32
  }
}

</mosaic_0001>

<bundles_post_ra>
// kernel: neural_net_forward.1
= control target key start
LH: loop header
LB: loop body
LE: loop exit
PB: predicated region body
PF: predicated region fallthrough
CT: control target
= control target key end

     0   :  { %v470_v2 = vmov 1   ;;  %v471_v4 = vmov 0   ;;  %s581_s0 = inlined_call_operand.vmem [shape: f32[2,256], index: 0, kind: input, shape index: {}]   ;;  %s582_s1 = inlined_call_operand.vmem [shape: f32[168,128], index: 1, kind: input, shape index: {}]   ;;  %s583_s2 = inlined_call_operand.hbm [shape: f32[1,256], index: 2, kind: output, shape index: {}]  }
   0x1   :  { %v19_v0 = vld [vmem:[%s582_s1 + $0x10] sm:$0xff]  ;;  %v17_v1 = vld [vmem:[%s582_s1] sm:$0xff]  ;;  %410 = vset.pattern.permute.xlu0 %v470_v2  ;;  %408 = vset.pattern.permute.xlu1 %v470_v2  ;;  %v18_v3 = vld [vmem:[%s582_s1 + $0x8] sm:$0xff] }
   0x2   :  { %77 = vperm.xlu0 %410, %v19_v0   ;;  %69 = vperm.xlu1 %408, %v17_v1  }
   0x6   :  { %411 = vset.pattern.permute.xlu0 %v471_v4  ;;  %73 = vperm.xlu1 %408, %v18_v3  }
   0x7   :  { %7 = vsyncpa [#allocation3], 0  ;;  %23 = vperm.xlu0 %411, %v17_v1   ;;  %v20_v5 = vld [vmem:[%s582_s1 + $0x18] sm:$0xff]  ;;  %v14_v6 = vld [vmem:[%s582_s1 + $0x28] sm:$0xff]  ;;  %v472_v19 = vmov 0.0   ;;  %v42_v20 = vlaneseq  ;;  %vm182_vm0 = vcmask 261120  }
   0x8   :  { %v13_v7 = vld [vmem:[%s582_s1 + $0x20] sm:$0xff]  ;;  %v15_v9 = vld [vmem:[%s582_s1 + $0x30] sm:$0xff]  ;;  %v16_v11 = vld [vmem:[%s582_s1 + $0x38] sm:$0xff]  ;;  %259 = vmatprep.mubr.f32.mxu0 %v472_v19  ;;  %271 = vmatprep.mubr.f32.mxu1 %v472_v19 }
   0x9   :  { %v154_v8 = vld [vmem:[%s582_s1 + $0x60] sm:$0xff]  ;;  %v156_v10 = vld [vmem:[%s582_s1 + $0x70] sm:$0xff]  ;;  %v155_v13 = vld [vmem:[%s582_s1 + $0x68] sm:$0xff]  ;;  %v544_v21 = vshrl.u32 %v42_v20, 7  ;;  %vm370_vm1 = vcmp.lt.s32.totalorder %v42_v20, 256 }
   0xa   :  { %409 = vset.pattern.permute.xlu1 %v471_v4  ;;  %v293_v12 = vld [vmem:[%s582_s1 + $0x80] sm:$0xff]  ;;  %v295_v14 = vld [vmem:[%s582_s1 + $0x90] sm:$0xff]  ;;  %v157_v15 = vld [vmem:[%s582_s1 + $0x78] sm:$0xff] }
   0xb   :  { %28 = vperm.xlu0 %411, %v18_v3   ;;  %38 = vperm.xlu1 %409, %v20_v5   ;;  %v292_v16 = vld [vmem:[%s582_s1 + $0xa0] sm:$0x1]  ;;  %v294_v17 = vld [vmem:[%s582_s1 + $0x88] sm:$0xff]  ;;  %v296_v18 = vld [vmem:[%s582_s1 + $0x98] sm:$0xff]  ;;  %v44_v24 = vsub.s32 0, %v544_v21  ;;  %v48_v25 = vsub.s32 2, %v544_v21 }
   0xc   :  { %v86_v26 = vsub.s32 1, %v544_v21  ;;  %v90_v27 = vsub.s32 3, %v544_v21  ;;  %v12_v28 = vld [vmem:[%s581_s0] sm:$0xf] }
   0xd   :  { %v45_v31 = vrot.slane %v12_v28, %v44_v24  ;;  %v49_v32 = vrot.slane %v12_v28, %v48_v25 }
   0xe   :  { %v87_v33 = vrot.slane %v12_v28, %v86_v26  ;;  %v91_v34 = vrot.slane %v12_v28, %v90_v27 }
   0xf   :  { %33 = vperm.xlu0 %411, %v19_v0   ;;  %412 = vset.pattern.permute.xlu1 %v470_v2  ;;  %v55_v35 = vrot.slane %v45_v31, %v44_v24  ;;  %v59_v38 = vrot.slane %v49_v32, %v44_v24  ;;  %v160_v31 = vld [vmem:[%s582_s1 + $0x50] sm:$0xff]  ;;  %v159_v32 = vld [vmem:[%s582_s1 + $0x48] sm:$0xff] }
  0x10   :  { %81 = vperm.xlu1 %412, %v20_v5   ;;  %v97_v39 = vrot.slane %v87_v33, %v86_v26  ;;  %v101_v40 = vrot.slane %v91_v34, %v86_v26  ;;  %v161_v33 = vld [vmem:[%s582_s1 + $0x58] sm:$0xff] }
  0x13   :  { %125 = vperm.xlu0 %411, %v14_v6  }
  0x14   :  { %413 = vset.pattern.permute.xlu1 %v471_v4 }
  0x15   :  { %120 = vperm.xlu1 %413, %v13_v7  }
  0x17   :  { %164 = vperm.xlu0 %411, %v154_v8  }
  0x19   :  { %130 = vperm.xlu1 %413, %v15_v9  }
  0x1b   :  { %174 = vperm.xlu0 %411, %v156_v10  }
  0x1d   :  { %135 = vperm.xlu1 %413, %v16_v11  }
  0x1f   :  { %299 = vperm.xlu0 %411, %v293_v12  }
  0x21   :  { %169 = vperm.xlu1 %413, %v155_v13  }
  0x23   :  { %309 = vperm.xlu0 %411, %v295_v14  }
  0x25   :  { %179 = vperm.xlu1 %413, %v157_v15  }
  0x27   :  { %345 = vperm.xlu0 %411, %v292_v16  }
  0x29   :  { %304 = vperm.xlu1 %413, %v294_v17  }
  0x2d   :  { %314 = vperm.xlu1 %413, %v296_v18  }
  0x81   :  { %v70_v22 = vpop.permute.xlu1 %69  ;;  %v78_v23 = vpop.permute.xlu0 %77 }
  0x82   :  { %v102_v49 = vmul.f32 %v97_v39, %v70_v22  ;;  %v103_v50 = vmul.f32 %v101_v40, %v70_v22  ;;  %v106_v61 = vmul.f32 %v97_v39, %v78_v23  ;;  %v107_v0 = vmul.f32 %v101_v40, %v78_v23 }
  0x85   :  { %v74_v29 = vpop.permute.xlu1 %73 }
  0x86   :  { %v24_v30 = vpop.permute.xlu0 %23  ;;  %v104_v45 = vmul.f32 %v97_v39, %v74_v29  ;;  %v105_v46 = vmul.f32 %v101_v40, %v74_v29 }
  0x87   :  { %v60_v43 = vmul.f32 %v55_v35, %v24_v30  ;;  %v61_v47 = vmul.f32 %v59_v38, %v24_v30  ;;  %v158_v30 = vld [vmem:[%s582_s1 + $0x40] sm:$0xff]  ;;  %s474_s1 = smov [#allocation2]  }
  0x88   :  { %s379_s24 = sshll.u32 %s474_s1, 4  ;;  %s380_s24 = int_to_ptr.vmem [resolvable:$true] %s379_s24 }
  0x89   :  { %v110_v54 = vadd.f32 %v102_v49, %v60_v43  ;;  %v111_v58 = vadd.f32 %v103_v50, %v61_v47  ;;  %s446_s25 = scalar_lea.vmem %s380_s24, 32  ;;  %p451_p1 = scmp.lt.s32.totalorder %s380_s24, %s380_s24 }
  0x8a   :  { %v29_v36 = vpop.permute.xlu0 %28  ;;  %v39_v37 = vpop.permute.xlu1 %38  ;;  %p447_p0 = scmp.ne.s32.totalorder %s380_s24, %s446_s25  ;;  %p452_p2 = scmp.lt.s32.totalorder %s446_s25, %s446_s25 }
  0x8b   :  { %v62_v41 = vmul.f32 %v55_v35, %v29_v36  ;;  %v63_v42 = vmul.f32 %v59_v38, %v29_v36  ;;  %v66_v6 = vmul.f32 %v55_v35, %v39_v37  ;;  %v67_v7 = vmul.f32 %v59_v38, %v39_v37 }
  0x8c   :  { %p453_p3 = por %p452_p2, %p451_p1 }
  0x8d   :  { %v112_v51 = vadd.f32 %v104_v45, %v62_v41  ;;  %v113_v52 = vadd.f32 %v105_v46, %v63_v42 }
  0x8e   :  { %v34_v44 = vpop.permute.xlu0 %33  ;;  %p454_p4 = pnand %p453_p3, %p447_p0 }
  0x8f   :  { %v82_v48 = vpop.permute.xlu1 %81  ;;  %v64_v55 = vmul.f32 %v55_v35, %v34_v44  ;;  %v65_v59 = vmul.f32 %v59_v38, %v34_v44 }
  0x90   :  { %v108_v1 = vmul.f32 %v97_v39, %v82_v48  ;;  %v109_v2 = vmul.f32 %v101_v40, %v82_v48 }
  0x91   :  { %v114_v3 = vadd.f32 %v106_v61, %v64_v55  ;;  %v115_v5 = vadd.f32 %v107_v0, %v65_v59 }
  0x92   :  { %v126_v53 = vpop.permute.xlu0 %125  ;;  %v116_v10 = vadd.f32 %v108_v1, %v66_v6  ;;  %v117_v11 = vadd.f32 %v109_v2, %v67_v7 }
  0x93   :  { %v140_v56 = vadd.f32 %v126_v53, %v112_v51  ;;  %v141_v57 = vadd.f32 %v126_v53, %v113_v52 }
  0x94   :  { %v121_v60 = vpop.permute.xlu1 %120 }
  0x95   :  { %414 = vtanh.f32 %v140_v56  ;;  %v138_v62 = vadd.f32 %v121_v60, %v110_v54  ;;  %v139_v63 = vadd.f32 %v121_v60, %v111_v58 }
  0x96   :  { %416 = vtanh.f32 %v141_v57  ;;  %v165_v34 = vpop.permute.xlu0 %164 }
  0x97   :  { %418 = vtanh.f32 %v138_v62 }
  0x98   :  { %420 = vtanh.f32 %v139_v63  ;;  %v131_v4 = vpop.permute.xlu1 %130 }
  0x99   :  { %v142_v8 = vadd.f32 %v131_v4, %v114_v3  ;;  %v143_v9 = vadd.f32 %v131_v4, %v115_v5 }
  0x9a   :  { %v175_v36 = vpop.permute.xlu0 %174 }
  0x9b   :  { %422 = vtanh.f32 %v142_v8 }
  0x9c   :  { %v136_v12 = vpop.permute.xlu1 %135  ;;  %424 = vtanh.f32 %v143_v9 }
  0x9d   :  { %v144_v13 = vadd.f32 %v136_v12, %v116_v10  ;;  %v145_v14 = vadd.f32 %v136_v12, %v117_v11 }
  0x9e   :  { %v300_v54 = vpop.permute.xlu0 %299 }
  0x9f   :  { %v415_v15 = vpop.eup %414  ;;  %426 = vtanh.f32 %v144_v13 }
  0xa0   :  { %v417_v16 = vpop.eup %416  ;;  %428 = vtanh.f32 %v145_v14  ;;  %v170_v35 = vpop.permute.xlu1 %169 }
  0xa1   :  { %v419_v17 = vpop.eup %418 }
  0xa2   :  { %v421_v18 = vpop.eup %420  ;;  %v393_v22 = vpack.c.bf16 %v415_v15, %v419_v17  ;;  %v310_v0 = vpop.permute.xlu0 %309 }
  0xa3   :  { %v391_v23 = vpack.c.bf16 %v417_v16, %v421_v18 }
  0xa4   :  { %v180_v44 = vpop.permute.xlu1 %179 }
  0xa5   :  { %392 = vmatprep.subr.bf16.mxu0 %v391_v23  ;;  %399 = vmatprep.subr.bf16.mxu1 %v391_v23  ;;  %v423_v24 = vpop.eup %422 }
  0xa6   :  { %394 = vmatpush1.bf16.msra.mxu0 %v393_v22  ;;  %401 = vmatpush1.bf16.msra.mxu1 %v393_v22  ;;  %v425_v25 = vpop.eup %424 }
  0xa8   :  { %v305_v57 = vpop.permute.xlu1 %304 }
  0xa9   :  { %v427_v26 = vpop.eup %426 }
  0xaa   :  { %v429_v27 = vpop.eup %428  ;;  %v397_v28 = vpack.c.bf16 %v427_v26, %v423_v24 }
  0xab   :  { %v395_v29 = vpack.c.bf16 %v429_v27, %v425_v25  ;;  %v473_v25 = vmov 1966171168  }
  0xac   :  { %v315_v6 = vpop.permute.xlu1 %314  ;;  %v354_v26 = vunpack.c.l.s4 %v473_v25 }
  0xad   :  { %396 = vmatprep.subr.bf16.mxu0 %v395_v29  ;;  %400 = vmatprep.subr.bf16.mxu1 %v395_v29 }
  0xae   :  { %398 = vmatpush1.bf16.msra.mxu0 %v397_v28  ;;  %402 = vmatpush1.bf16.msra.mxu1 %v397_v28 }
  0xb1   :  { %387 = vmatmul.mubr.msk.f32.vlgmr.msra.gmra.mrb[0].mxu0 %vm182_vm0, %v158_v30  ;;  %389 = vmatmul.mubr.msk.f32.vlgmr.msra.gmra.mrb[0].mxu1 %vm182_vm0, %v160_v31  ;;  %v355_v31 = vunpack.c.0.s8 %v354_v26 }
  0xb2   :  { %265 = vmatprep.mubr.f32.mxu0 %v472_v19  ;;  %277 = vmatprep.mubr.f32.mxu1 %v472_v19 }
  0xb5   :  { %388 = vmatmul.mubr.msk.f32.gmra.mrb[2].mxu0 %vm182_vm0, %v159_v32  ;;  %390 = vmatmul.mubr.msk.f32.gmra.mrb[2].mxu1 %vm182_vm0, %v161_v33  ;;  %v346_v32 = vpop.permute.xlu0 %345 }
 0x184   :  { %v261_v37 = vpop.f32.mrb[0].mxu0  ;;  %v273_v38 = vpop.f32.mrb[0].mxu1 }
 0x185   :  { %v262_v39 = vadd.f32 %v261_v37, %v165_v34  ;;  %v274_v40 = vadd.f32 %v273_v38, %v175_v36  ;;  %v263_v41 = vpop.f32.mrb[1].mxu0  ;;  %v275_v42 = vpop.f32.mrb[1].mxu1 }
 0x186   :  { %v264_v19 = vadd.f32 %v263_v41, %v165_v34  ;;  %v276_v43 = vadd.f32 %v275_v42, %v175_v36  ;;  %v358_v36 = vsub.s32 %v355_v31, %v544_v21 }
 0x187   :  { %430 = vtanh.f32 %v262_v39 }
 0x188   :  { %432 = vtanh.f32 %v274_v40  ;;  %v267_v45 = vpop.f32.mrb[2].mxu0  ;;  %v279_v46 = vpop.f32.mrb[2].mxu1 }
 0x189   :  { %434 = vtanh.f32 %v264_v19  ;;  %v268_v47 = vadd.f32 %v267_v45, %v170_v35  ;;  %v280_v48 = vadd.f32 %v279_v46, %v180_v44  ;;  %v269_v49 = vpop.f32.mrb[3].mxu0  ;;  %v281_v50 = vpop.f32.mrb[3].mxu1 }
 0x18a   :  { %436 = vtanh.f32 %v276_v43  ;;  %v270_v51 = vadd.f32 %v269_v49, %v170_v35  ;;  %v282_v52 = vadd.f32 %v281_v50, %v180_v44 }
 0x18b   :  { %438 = vtanh.f32 %v268_v47 }
 0x18c   :  { %440 = vtanh.f32 %v280_v48 }
 0x18d   :  { %442 = vtanh.f32 %v270_v51 }
 0x18e   :  { %444 = vtanh.f32 %v282_v52 }
 0x191   :  { %v431_v53 = vpop.eup %430 }
 0x192   :  { %v433_v55 = vpop.eup %432  ;;  %v317_v61 = vmul.f32 %v431_v53, %v300_v54 }
 0x193   :  { %v435_v56 = vpop.eup %434  ;;  %v321_v1 = vmul.f32 %v433_v55, %v310_v0 }
 0x194   :  { %v437_v58 = vpop.eup %436  ;;  %v318_v2 = vmul.f32 %v435_v56, %v300_v54 }
 0x195   :  { %v439_v59 = vpop.eup %438  ;;  %v322_v7 = vmul.f32 %v437_v58, %v310_v0 }
 0x196   :  { %v441_v60 = vpop.eup %440  ;;  %v319_v62 = vmul.f32 %v439_v59, %v305_v57 }
 0x197   :  { %v443_v63 = vpop.eup %442  ;;  %v323_v8 = vmul.f32 %v441_v60, %v315_v6 }
 0x198   :  { %v325_v3 = vadd.f32 %v319_v62, %v317_v61  ;;  %v320_v4 = vmul.f32 %v443_v63, %v305_v57  ;;  %v445_v5 = vpop.eup %444 }
 0x199   :  { %v324_v12 = vmul.f32 %v445_v5, %v315_v6 }
 0x19a   :  { %v326_v9 = vadd.f32 %v325_v3, %v321_v1  ;;  %v334_v10 = vadd.f32 %v320_v4, %v318_v2 }
 0x19c   :  { %v327_v11 = vadd.f32 %v326_v9, %v323_v8  ;;  %v335_v13 = vadd.f32 %v334_v10, %v322_v7 }
 0x19e   :  { %v328_v14 = vrot.slane %v327_v11, 4  ;;  %v336_v15 = vadd.f32 %v335_v13, %v324_v12 }
 0x1a0   :  { %v337_v16 = vrot.slane %v336_v15, 4  ;;  %v329_v17 = vadd.f32 %v328_v14, %v327_v11 }
 0x1a2   :  { %v330_v18 = vrot.slane %v329_v17, 2  ;;  %v338_v22 = vadd.f32 %v337_v16, %v336_v15 }
 0x1a4   :  { %v331_v23 = vadd.f32 %v330_v18, %v329_v17  ;;  %v339_v24 = vrot.slane %v338_v22, 2 }
 0x1a6   :  { %v332_v27 = vrot.slane %v331_v23, 1  ;;  %v340_v28 = vadd.f32 %v339_v24, %v338_v22 }
 0x1a8   :  { %v333_v29 = vadd.f32 %v332_v27, %v331_v23  ;;  %v341_v30 = vrot.slane %v340_v28, 1 }
 0x1aa   :  { %v342_v33 = vadd.f32 %v341_v30, %v340_v28  ;;  %v348_v34 = vadd.f32 %v346_v32, %v333_v29 }
 0x1ac   :  { %v349_v35 = vadd.f32 %v346_v32, %v342_v33 }
 0x1ae   :  { %v352_v37 = vcombine.low %v348_v34, %v349_v35 }
 0x1b0   :  { %v359_v38 = vrot.slane %v352_v37, %v358_v36 }
 0x1b2   :  { %v366_v39 = vrot.slane %v359_v38, %v358_v36 }
 0x1b4   :  { %372 = vst.msk [vmem:[#allocation2] sm:$0x3] %vm370_vm1, %v366_v39 }
 0x1b5   :  { %457 = shalt.err (!%p454_p4)
}
 0x1b6   :  { %s458_s28 = scalar_lea.hbm %s583_s2, 32 }
 0x1b7   :  { %p459_p5 = scmp.ne.s32.totalorder %s583_s2, %s458_s28  ;;  %p462_p6 = scmp.lt.u32.totalorder %s458_s28, %s583_s2 }
 0x1b9   :  { %p464_p7 = pnand %p462_p6, %p459_p5 }
 0x1bb   :  { %467 = shalt.err (!%p464_p7)
}
 0x1bc   :  { %382 = dma.vmem_to_hbm [thread:$0]  %s380_s24, 32, %s583_s2, [#allocation3]  }
 0x1bd   :  { %468 = dma.done.wait [#allocation3], 32  }
 0x1be   :  { %469 = vsyncadd [#allocation3], 4294967264 }
 0x1bf   :  { %386 = vsyncpa [#allocation3], 1 }

</bundles_post_ra>
